<compile_context>
chip_gen: v6e
topology: v6e:2x2x1
jax: 0.10.0
libtpu: 0.0.40
codegen_flags: <defaults>
</compile_context>

<pallas_src>
import functools

import jax
import jax.numpy as jnp
from jax import lax
from jax.experimental import pallas as pl
from jax.experimental.pallas import tpu as pltpu


def _ce_acc_kernel(x_ref, y_ref, out_ref, *, n_total):
    """Per-tile partial sums of cross-entropy and correct-prediction counts.

    x_ref  : (TILE_N, C) logits block in VMEM
    y_ref  : (TILE_N, 1) int32 labels block in VMEM
    out_ref: (1, 8, 128) f32 partial block
             (row 0: lane 0 = sum per-sample CE, lane 1 = sum correct preds)
    """
    i = pl.program_id(0)
    n_tiles = pl.num_programs(0)

    x = x_ref[...].astype(jnp.float32)          # (TILE_N, C)
    y = y_ref[...]                              # (TILE_N, 1) int32
    tn, c = x.shape

    # ---- cross entropy via numerically stable log-softmax ----
    m = jnp.max(x, axis=1, keepdims=True)                       # (TILE_N, 1)
    z = x - m                                                   # (TILE_N, C)
    lse = jnp.log(jnp.sum(jnp.exp(z), axis=1, keepdims=True))   # (TILE_N, 1)

    col = lax.broadcasted_iota(jnp.int32, (tn, c), 1)           # (TILE_N, C)
    true_z = jnp.sum(jnp.where(col == y, z, 0.0), axis=1, keepdims=True)
    per_ce = lse - true_z                                       # (TILE_N, 1)

    # ---- accuracy: first maximal index (torch.argmax tie-break parity) ----
    pred = jnp.min(jnp.where(x == m, col, jnp.int32(c)), axis=1, keepdims=True)
    correct = (pred == y).astype(jnp.float32)                   # (TILE_N, 1)

    def _write(ce_vec, ok_vec):
        lane = lax.broadcasted_iota(jnp.int32, (1, 8, 128), 2)
        out_ref[...] = jnp.where(lane == 0, jnp.sum(ce_vec),
                                 jnp.where(lane == 1, jnp.sum(ok_vec), 0.0))

    # Steady-state tiles: every row is valid; skip the mask / iota work.
    @pl.when(i < n_tiles - 1)
    def _steady():
        _write(per_ce, correct)

    # Last tile may be ragged (N % TILE_N != 0): rows past n_total contain
    # undefined data — mask them *before* summation (never sum-then-mask).
    @pl.when(i == n_tiles - 1)
    def _ragged():
        row = lax.broadcasted_iota(jnp.int32, (tn, 1), 0)
        valid = (i * tn + row) < n_total
        _write(jnp.where(valid, per_ce, 0.0), jnp.where(valid, correct, 0.0))


def _round_up(v, m):
    return ((v + m - 1) // m) * m


def filtered_data_loss(inputs, labels, *, tile_n=None):
    """inputs: (N, C) float logits; labels: (N,) int labels.
    Returns (loss, acc) f32 scalars (CrossEntropyLoss mean + accuracy)."""
    inputs = jnp.asarray(inputs)
    labels = jnp.asarray(labels)
    n, c = inputs.shape
    itemsize = inputs.dtype.itemsize
    c_pad = _round_up(c, 128)        # lane padding of the class axis in VMEM

    # --- per-generation VMEM budget (v5e/v6e: 128 MiB physical, v7x: 64) ---
    try:
        vmem_cap = int(getattr(pltpu.get_tpu_info(), "vmem_capacity_bytes",
                               64 << 20))
    except Exception:                 # conservative fallback
        vmem_cap = 64 << 20
    if vmem_cap >= (100 << 20):
        work_budget, limit_cap = 56 << 20, 96 << 20    # v5e / v6e
    else:
        work_budget, limit_cap = 36 << 20, 56 << 20    # v7x / unknown

    # Per-row VMEM cost: double-buffered logits block (lane-padded to 128),
    # double-buffered (TILE_N, 1) int32 labels block (lane-padded to 128),
    # plus ~4 block-sized f32 Mosaic intermediates.
    per_row = 2 * c_pad * itemsize + 4 * c_pad * 4 + 2 * 128 * 4

    if tile_n is None:
        tile_n = work_budget // per_row
    tile_n = int(tile_n)
    tile_n = max(8, tile_n - tile_n % 8)
    if tile_n >= n:
        tile_n = n                    # single tile: block == full array dims

    num_tiles = pl.cdiv(n, tile_n)

    labels2d = labels.astype(jnp.int32).reshape(n, 1)

    kernel = functools.partial(_ce_acc_kernel, n_total=n)

    vmem_bytes = (2 * tile_n * c_pad * itemsize     # logits, double-buffered
                  + 2 * tile_n * 128 * 4            # labels, double-buffered
                  + 4 * tile_n * c_pad * 4          # Mosaic f32 intermediates
                  + 2 * 8 * 128 * 4)                # output partial blocks
    vmem_limit = int(max(16 << 20, min(vmem_bytes + (8 << 20), limit_cap)))

    cost = pl.CostEstimate(
        flops=6 * n * c,
        transcendentals=n * c + n,
        bytes_accessed=itemsize * n * c + 4 * n + num_tiles * 8 * 128 * 4,
    )

    partials = pl.pallas_call(
        kernel,
        out_shape=jax.ShapeDtypeStruct((num_tiles, 8, 128), jnp.float32),
        grid_spec=pltpu.PrefetchScalarGridSpec(
            num_scalar_prefetch=0,
            grid=(num_tiles,),
            in_specs=[
                pl.BlockSpec((tile_n, c), lambda i: (i, 0)),
                pl.BlockSpec((tile_n, 1), lambda i: (i, 0)),
            ],
            out_specs=pl.BlockSpec((1, 8, 128), lambda i: (i, 0, 0)),
        ),
        compiler_params=pltpu.CompilerParams(
            # Independent per-tile partials -> parallel (megacore on v7x).
            dimension_semantics=("parallel",),
            vmem_limit_bytes=vmem_limit,
        ),
        cost_estimate=cost,
    )(inputs, labels2d)

    sums = jnp.sum(partials[:, 0, :2], axis=0)      # (2,) = [sum_ce, sum_ok]
    inv_n = jnp.float32(1.0 / n)
    # TODO(synk): torch CrossEntropyLoss ignore_index=-100 / class-weight
    # semantics are not handled; very large C would additionally need a
    # C-tiled streaming-logsumexp path.
    return sums[0] * inv_n, sums[1] * inv_n


def _reference(inputs, labels):
    # pure-JAX reference (nn.CrossEntropyLoss mean reduction + accuracy)
    logp = jax.nn.log_softmax(inputs.astype(jnp.float32), axis=1)
    n = inputs.shape[0]
    ce = -logp[jnp.arange(n), labels]
    loss = jnp.mean(ce)
    acc = jnp.mean((jnp.argmax(inputs, axis=1) == labels).astype(jnp.float32))
    return loss, acc


if __name__ == "__main__":
    key = jax.random.PRNGKey(0)

    # Case 1: small demo shapes matching the module (batch=8, classes=32),
    # default (auto) tile sizing -> single full-array tile.
    k1, k2 = jax.random.split(key)
    N, C = 8, 32
    inputs = jax.random.normal(k1, (N, C), dtype=jnp.float32)
    labels = jax.random.randint(k2, (N,), 0, C, dtype=jnp.int32)

    loss, acc = filtered_data_loss(inputs, labels)
    jax.block_until_ready((loss, acc))
    ref_loss, ref_acc = _reference(inputs, labels)
    assert jnp.allclose(loss, ref_loss, rtol=1e-5, atol=1e-5), (loss, ref_loss)
    assert jnp.allclose(acc, ref_acc, atol=1e-6), (acc, ref_acc)

    # Case 2: multi-tile path with a ragged (but 8-aligned) last tile.
    k3, k4 = jax.random.split(k2)
    N2, C2 = 200, 32
    inputs2 = jax.random.normal(k3, (N2, C2), dtype=jnp.float32)
    labels2 = jax.random.randint(k4, (N2,), 0, C2, dtype=jnp.int32)

    loss2, acc2 = filtered_data_loss(inputs2, labels2, tile_n=64)
    jax.block_until_ready((loss2, acc2))
    ref_loss2, ref_acc2 = _reference(inputs2, labels2)
    assert jnp.allclose(loss2, ref_loss2, rtol=1e-5, atol=1e-5), (loss2, ref_loss2)
    assert jnp.allclose(acc2, ref_acc2, atol=1e-6), (acc2, ref_acc2)

    # Case 3: N not a multiple of 8 — exercises the no-pad in-kernel mask.
    k5, k6 = jax.random.split(k4)
    N3, C3 = 203, 32
    inputs3 = jax.random.normal(k5, (N3, C3), dtype=jnp.float32)
    labels3 = jax.random.randint(k6, (N3,), 0, C3, dtype=jnp.int32)

    loss3, acc3 = filtered_data_loss(inputs3, labels3, tile_n=64)
    jax.block_until_ready((loss3, acc3))
    ref_loss3, ref_acc3 = _reference(inputs3, labels3)
    assert jnp.allclose(loss3, ref_loss3, rtol=1e-5, atol=1e-5), (loss3, ref_loss3)
    assert jnp.allclose(acc3, ref_acc3, atol=1e-6), (acc3, ref_acc3)

    print("KERNEL_OK")
</pallas_src>

<mosaic_0001>
module attributes {stable_mosaic.version = 11 : i64} {
  func.func @_ce_acc_kernel(%arg0: i32, %arg1: memref<8x32xf32, #tpu.memory_space<vmem>>, %arg2: memref<8x1xi32, #tpu.memory_space<vmem>>, %arg3: memref<1x8x128xf32, #tpu.memory_space<vmem>>) attributes {dimension_semantics = [#tpu.dimension_semantics<parallel>], iteration_bounds = array<i64: 1>, scalar_prefetch = 0 : i64, scratch_operands = 0 : i64, tpu.core_type = #tpu.core_type<tc>, window_params = [{transform_indices = @transform_0, window_bounds = array<i64: 8, 32>}, {transform_indices = @transform_1, window_bounds = array<i64: 8, 1>}, {transform_indices = @transform_2, window_bounds = array<i64: 1, 8, 128>}]} {
    %c0 = arith.constant 0 : index
    %c0_0 = arith.constant 0 : index
    %0 = vector.load %arg1[%c0, %c0_0] : memref<8x32xf32, #tpu.memory_space<vmem>>, vector<8x32xf32>
    %c0_1 = arith.constant 0 : index
    %c0_2 = arith.constant 0 : index
    %1 = vector.load %arg2[%c0_1, %c0_2] : memref<8x1xi32, #tpu.memory_space<vmem>>, vector<8x1xi32>
    %cst = arith.constant dense<0xFF800000> : vector<8xf32>
    %2 = vector.multi_reduction <maximumf>, %0, %cst [1] : vector<8x32xf32> to vector<8xf32>
    %3 = vector.shape_cast %2 : vector<8xf32> to vector<8x1xf32>
    %4 = vector.broadcast %3 : vector<8x1xf32> to vector<8x32xf32>
    %5 = arith.subf %0, %4 : vector<8x32xf32>
    %6 = math.exp %5 : vector<8x32xf32>
    %cst_3 = arith.constant dense<0.000000e+00> : vector<8xf32>
    %7 = vector.multi_reduction <add>, %6, %cst_3 [1] : vector<8x32xf32> to vector<8xf32>
    %8 = vector.shape_cast %7 : vector<8xf32> to vector<8x1xf32>
    %9 = math.log %8 : vector<8x1xf32>
    %10 = tpu.iota {dimensions = array<i32: 1>} : vector<8x32xi32>
    %11 = vector.broadcast %1 : vector<8x1xi32> to vector<8x32xi32>
    %12 = arith.cmpi eq, %10, %11 : vector<8x32xi32>
    %cst_4 = arith.constant 0.000000e+00 : f32
    %13 = vector.broadcast %cst_4 : f32 to vector<8x32xf32>
    %14 = arith.select %12, %5, %13 : vector<8x32xi1>, vector<8x32xf32>
    %cst_5 = arith.constant dense<0.000000e+00> : vector<8xf32>
    %15 = vector.multi_reduction <add>, %14, %cst_5 [1] : vector<8x32xf32> to vector<8xf32>
    %16 = vector.shape_cast %15 : vector<8xf32> to vector<8x1xf32>
    %17 = arith.subf %9, %16 : vector<8x1xf32>
    %18 = vector.broadcast %3 : vector<8x1xf32> to vector<8x32xf32>
    %19 = arith.cmpf oeq, %0, %18 : vector<8x32xf32>
    %c32_i32 = arith.constant 32 : i32
    %20 = vector.broadcast %c32_i32 : i32 to vector<8x32xi32>
    %21 = arith.select %19, %10, %20 : vector<8x32xi1>, vector<8x32xi32>
    %cst_6 = arith.constant dense<2147483647> : vector<8xi32>
    %22 = vector.multi_reduction <minsi>, %21, %cst_6 [1] : vector<8x32xi32> to vector<8xi32>
    %23 = vector.shape_cast %22 : vector<8xi32> to vector<8x1xi32>
    %24 = arith.cmpi eq, %23, %1 : vector<8x1xi32>
    %25 = arith.extui %24 : vector<8x1xi1> to vector<8x1xi32>
    %26 = arith.sitofp %25 : vector<8x1xi32> to vector<8x1xf32>
    %c0_i32 = arith.constant 0 : i32
    %27 = arith.cmpi slt, %arg0, %c0_i32 : i32
    %28 = arith.extui %27 : i1 to i32
    %c0_i32_7 = arith.constant 0 : i32
    %29 = arith.cmpi ne, %28, %c0_i32_7 : i32
    scf.if %29 {
      %33 = tpu.iota {dimensions = array<i32: 2>} : vector<1x8x128xi32>
      %c0_i32_10 = arith.constant 0 : i32
      %34 = vector.broadcast %c0_i32_10 : i32 to vector<1x8x128xi32>
      %35 = arith.cmpi eq, %33, %34 : vector<1x8x128xi32>
      %36 = vector.shape_cast %17 : vector<8x1xf32> to vector<1x8x1xf32>
      %cst_11 = arith.constant dense<0.000000e+00> : vector<1xf32>
      %37 = vector.multi_reduction <add>, %36, %cst_11 [1, 2] : vector<1x8x1xf32> to vector<1xf32>
      %38 = vector.shape_cast %37 : vector<1xf32> to vector<1x1x1xf32>
      %39 = vector.extract %38[0, 0, 0] : f32 from vector<1x1x1xf32>
      %c1_i32 = arith.constant 1 : i32
      %40 = vector.broadcast %c1_i32 : i32 to vector<1x8x128xi32>
      %41 = arith.cmpi eq, %33, %40 : vector<1x8x128xi32>
      %42 = vector.shape_cast %26 : vector<8x1xf32> to vector<1x8x1xf32>
      %cst_12 = arith.constant dense<0.000000e+00> : vector<1xf32>
      %43 = vector.multi_reduction <add>, %42, %cst_12 [1, 2] : vector<1x8x1xf32> to vector<1xf32>
      %44 = vector.shape_cast %43 : vector<1xf32> to vector<1x1x1xf32>
      %45 = vector.extract %44[0, 0, 0] : f32 from vector<1x1x1xf32>
      %cst_13 = arith.constant 0.000000e+00 : f32
      %46 = vector.broadcast %45 : f32 to vector<1x8x128xf32>
      %47 = vector.broadcast %cst_13 : f32 to vector<1x8x128xf32>
      %48 = arith.select %41, %46, %47 : vector<1x8x128xi1>, vector<1x8x128xf32>
      %49 = vector.broadcast %39 : f32 to vector<1x8x128xf32>
      %50 = arith.select %35, %49, %48 : vector<1x8x128xi1>, vector<1x8x128xf32>
      %c0_14 = arith.constant 0 : index
      %c0_15 = arith.constant 0 : index
      %c0_16 = arith.constant 0 : index
      %51 = vector.load %arg3[%c0_14, %c0_15, %c0_16] : memref<1x8x128xf32, #tpu.memory_space<vmem>>, vector<1x8x128xf32>
      tpu.vector_store %arg3[%c0_14, %c0_15, %c0_16], %50 {strides = array<i32>} : memref<1x8x128xf32, #tpu.memory_space<vmem>>, vector<1x8x128xf32>,
    } else {
    }
    %c0_i32_8 = arith.constant 0 : i32
    %30 = arith.cmpi eq, %arg0, %c0_i32_8 : i32
    %31 = arith.extui %30 : i1 to i32
    %c0_i32_9 = arith.constant 0 : i32
    %32 = arith.cmpi ne, %31, %c0_i32_9 : i32
    scf.if %32 {
      %33 = tpu.iota {dimensions = array<i32: 0>} : vector<8x1xi32>
      %c8_i32 = arith.constant 8 : i32
      %34 = arith.muli %arg0, %c8_i32 : i32
      %35 = vector.broadcast %34 : i32 to vector<8x1xi32>
      %36 = arith.addi %35, %33 : vector<8x1xi32>
      %c8_i32_10 = arith.constant 8 : i32
      %37 = vector.broadcast %c8_i32_10 : i32 to vector<8x1xi32>
      %38 = arith.cmpi slt, %36, %37 : vector<8x1xi32>
      %cst_11 = arith.constant 0.000000e+00 : f32
      %39 = vector.broadcast %cst_11 : f32 to vector<8x1xf32>
      %40 = arith.select %38, %17, %39 : vector<8x1xi1>, vector<8x1xf32>
      %cst_12 = arith.constant 0.000000e+00 : f32
      %41 = vector.broadcast %cst_12 : f32 to vector<8x1xf32>
      %42 = arith.select %38, %26, %41 : vector<8x1xi1>, vector<8x1xf32>
      %43 = tpu.iota {dimensions = array<i32: 2>} : vector<1x8x128xi32>
      %c0_i32_13 = arith.constant 0 : i32
      %44 = vector.broadcast %c0_i32_13 : i32 to vector<1x8x128xi32>
      %45 = arith.cmpi eq, %43, %44 : vector<1x8x128xi32>
      %46 = vector.shape_cast %40 : vector<8x1xf32> to vector<1x8x1xf32>
      %cst_14 = arith.constant dense<0.000000e+00> : vector<1xf32>
      %47 = vector.multi_reduction <add>, %46, %cst_14 [1, 2] : vector<1x8x1xf32> to vector<1xf32>
      %48 = vector.shape_cast %47 : vector<1xf32> to vector<1x1x1xf32>
      %49 = vector.extract %48[0, 0, 0] : f32 from vector<1x1x1xf32>
      %c1_i32 = arith.constant 1 : i32
      %50 = vector.broadcast %c1_i32 : i32 to vector<1x8x128xi32>
      %51 = arith.cmpi eq, %43, %50 : vector<1x8x128xi32>
      %52 = vector.shape_cast %42 : vector<8x1xf32> to vector<1x8x1xf32>
      %cst_15 = arith.constant dense<0.000000e+00> : vector<1xf32>
      %53 = vector.multi_reduction <add>, %52, %cst_15 [1, 2] : vector<1x8x1xf32> to vector<1xf32>
      %54 = vector.shape_cast %53 : vector<1xf32> to vector<1x1x1xf32>
      %55 = vector.extract %54[0, 0, 0] : f32 from vector<1x1x1xf32>
      %cst_16 = arith.constant 0.000000e+00 : f32
      %56 = vector.broadcast %55 : f32 to vector<1x8x128xf32>
      %57 = vector.broadcast %cst_16 : f32 to vector<1x8x128xf32>
      %58 = arith.select %51, %56, %57 : vector<1x8x128xi1>, vector<1x8x128xf32>
      %59 = vector.broadcast %49 : f32 to vector<1x8x128xf32>
      %60 = arith.select %45, %59, %58 : vector<1x8x128xi1>, vector<1x8x128xf32>
      %c0_17 = arith.constant 0 : index
      %c0_18 = arith.constant 0 : index
      %c0_19 = arith.constant 0 : index
      %61 = vector.load %arg3[%c0_17, %c0_18, %c0_19] : memref<1x8x128xf32, #tpu.memory_space<vmem>>, vector<1x8x128xf32>
      tpu.vector_store %arg3[%c0_17, %c0_18, %c0_19], %60 {strides = array<i32>} : memref<1x8x128xf32, #tpu.memory_space<vmem>>, vector<1x8x128xf32>,
    } else {
    }
    return
  }
  func.func @transform_0(%arg0: i32) -> (i32, i32) {
    %c0_i32 = arith.constant 0 : i32
    %c0_i32_0 = arith.constant 0 : i32
    return %arg0, %c0_i32 : i32, i32
  }
  func.func @transform_1(%arg0: i32) -> (i32, i32) {
    %c0_i32 = arith.constant 0 : i32
    %c0_i32_0 = arith.constant 0 : i32
    return %arg0, %c0_i32 : i32, i32
  }
  func.func @transform_2(%arg0: i32) -> (i32, i32, i32) {
    %c0_i32 = arith.constant 0 : i32
    %c0_i32_0 = arith.constant 0 : i32
    %c0_i32_1 = arith.constant 0 : i32
    return %arg0, %c0_i32, %c0_i32_0 : i32, i32, i32
  }
}

</mosaic_0001>

<bundles_post_ra>
// kernel: tpu_custom_call.1
= control target key start
LH: loop header
LB: loop body
LE: loop exit
PB: predicated region body
PF: predicated region fallthrough
CT: control target
= control target key end

     0   :  { %vm14_vm0 = vcmask 261120   ;;  %s216_s0 = inlined_call_operand.vmem [shape: f32[8,32], index: 0, kind: input, shape index: {}]   ;;  %s217_s1 = inlined_call_operand.vmem [shape: s32[8,1], index: 1, kind: input, shape index: {}]   ;;  %s218_s2 = inlined_call_operand.hbm [shape: f32[1,8,128], index: 2, kind: output, shape index: {}]  }
   0x1   :  { %v12_v0 = vld [vmem:[%s216_s0] sm:$0xff] }
   0x2   :  { %v13_v1 = vld [vmem:[%s217_s1] sm:$0xff] }
   0x3   :  { %7 = vsyncpa [#allocation3], 0  ;;  %v15_v2 = vsel %vm14_vm0, %v12_v0, -inf  ;;  %v179_v3 = vmov 0   ;;  %v26_v4 = vlaneseq  ;;  %vm102_vm4 = vcmask 7168   ;;  %s181_s1 = smov [#allocation2]  }
   0x4   :  { %151 = vset.pattern.permute.xlu1 %v179_v3  ;;  %152 = vset.pattern.permute.xlu0 %v179_v3  ;;  %v180_v33 = vmov 0.0   ;;  %s135_s13 = sshll.u32 %s181_s1, 4  ;;  %s136_s13 = int_to_ptr.vmem [resolvable:$true] %s135_s13 }
   0x5   :  { %16 = vmax.xlane.f32.xlu0 %v15_v2  ;;  %29 = vperm.xlu1 %151, %v13_v1   ;;  %v204_v5 = vand.u32 127, %v26_v4  ;;  %s157_s15 = scalar_lea.vmem %s136_s13, 128  ;;  %p162_p1 = scmp.lt.s32.totalorder %s136_s13, %s136_s13 }
   0x6   :  { %p158_p0 = scmp.ne.s32.totalorder %s136_s13, %s157_s15  ;;  %p163_p2 = scmp.lt.s32.totalorder %s157_s15, %s157_s15 }
   0x7   :  { %vm113_vm6 = vcmp.eq.s32.totalorder %v204_v5, 1  ;;  %vm101_vm7 = vcmp.eq.s32.totalorder %v204_v5, 0 }
   0x8   :  { %p164_p3 = por %p163_p2, %p162_p1 }
   0xa   :  { %p165_p4 = pnand %p164_p3, %p158_p0 }
  0x80   :  { %v30_v16 = vpop.permute.xlu1 %29 }
  0x81   :  { %vm31_vm2 = vcmp.eq.s32.totalorder %v204_v5, %v30_v16 }
  0x8e   :  { %v17_v6 = vpop.xlane.xlu0 %16 }
  0x8f   :  { %v18_v7 = vsub.f32 %v12_v0, %v17_v6  ;;  %vm37_vm1 = vcmp.eq.f32.partialorder %v12_v0, %v17_v6 }
  0x90   :  { %v38_v8 = vsel %vm37_vm1, %v204_v5, 32 }
  0x91   :  { %v19_v9 = vmul.f32 1.442695, %v18_v7  ;;  %v39_v10 = vsel %vm14_vm0, %v38_v8, 2147483647  ;;  %v32_v20 = vsel %vm31_vm2, %v18_v7, 0.0 }
  0x92   :  { %v41_v11 = vshra.s32 %v39_v10, 16  ;;  %v40_v15 = vand.u32 65535, %v39_v10  ;;  %v33_v21 = vsel %vm14_vm0, %v32_v20, 0.0 }
  0x93   :  { %153 = vpow2.f32 %v19_v9 }
  0x94   :  { %v43_v12 = vcvt.s32.f32 %v41_v11  ;;  %v42_v18 = vcvt.s32.f32 %v40_v15 }
  0x96   :  { %44 = vmin.xlane.f32.xlu0 %v43_v12 }
  0xa0   :  { %v154_v13 = vpop.eup %153 }
  0xa1   :  { %v21_v14 = vsel %vm14_vm0, %v154_v13, 0.0 }
  0xa2   :  { %22 = vadd.xlane.f32.xlu1 %v21_v14 }
 0x11f   :  { %v45_v17 = vpop.xlane.xlu0 %44 }
 0x120   :  { %vm46_vm3 = vcmp.eq.f32.partialorder %v43_v12, %v45_v17  ;;  %v51_v23 = vcvt.f32.s32 %v45_v17 }
 0x121   :  { %v47_v19 = vsel %vm46_vm3, %v42_v18, inf }
 0x122   :  { %48 = vmin.xlane.f32.xlu0 %v47_v19  ;;  %v52_v26 = vshll.u32 %v51_v23, 16 }
 0x126   :  { %34 = vadd.xlane.f32.xlu0 %v33_v21 }
 0x12b   :  { %v23_v22 = vpop.xlane.xlu1 %22 }
 0x12c   :  { %155 = vlog2.f32 %v23_v22 }
 0x139   :  { %v156_v24 = vpop.eup %155 }
 0x13a   :  { %v25_v29 = vmul.f32 0.6931472, %v156_v24 }
 0x1ab   :  { %v49_v25 = vpop.xlane.xlu0 %48 }
 0x1ac   :  { %v50_v27 = vcvt.f32.s32 %v49_v25 }
 0x1ae   :  { %v53_v28 = vadd.s32 %v52_v26, %v50_v27 }
 0x1af   :  { %v35_v30 = vpop.xlane.xlu0 %34 }
 0x1b0   :  { %v36_v31 = vsub.f32 %v25_v29, %v35_v30  ;;  %vm54_vm5 = vcmp.eq.s32.totalorder %v53_v28, %v13_v1 }
 0x1b1   :  { %v143_v34 = vsel %vm54_vm5, 1.0, %v180_v33 }
 0x1b2   :  { %v103_v32 = vsel %vm102_vm4, %v36_v31, 0.0  ;;  %v114_v35 = vsel %vm102_vm4, %v143_v34, 0.0 }
 0x1b3   :  { %104 = vadd.xlane.f32.xlu0 %v103_v32 }
 0x1b7   :  { %115 = vadd.xlane.f32.xlu0 %v114_v35 }
 0x23c   :  { %v105_v36 = vpop.xlane.xlu0 %104 }
 0x23d   :  { %v106_v37 = vrot.slane %v105_v36, 4 }
 0x23f   :  { %v107_v38 = vadd.f32 %v106_v37, %v105_v36 }
 0x240   :  { %v116_v39 = vpop.xlane.xlu0 %115 }
 0x241   :  { %v108_v40 = vrot.slane %v107_v38, 2  ;;  %v117_v41 = vrot.slane %v116_v39, 4 }
 0x243   :  { %v118_v42 = vadd.f32 %v117_v41, %v116_v39  ;;  %v109_v43 = vadd.f32 %v108_v40, %v107_v38 }
 0x245   :  { %v119_v44 = vrot.slane %v118_v42, 2  ;;  %v110_v45 = vrot.slane %v109_v43, 1 }
 0x247   :  { %v120_v46 = vadd.f32 %v119_v44, %v118_v42  ;;  %v111_v47 = vadd.f32 %v110_v45, %v109_v43 }
 0x249   :  { %144 = vpush %v111_v47  ;;  %v121_v48 = vrot.slane %v120_v46, 1 }
 0x24b   :  { %v122_v49 = vadd.f32 %v121_v48, %v120_v46 }
 0x24d   :  { %146 = vpush %v122_v49 }
 0x27a   :  { %s145_s0 = spop %144 }
 0x27b   :  { %v126_v51 = vstv %s145_s0 }
 0x27e   :  { %s147_s14 = spop %146 }
 0x27f   :  { %v124_v50 = vstv %s147_s14 }
 0x280   :  { %v125_v52 = vsel %vm113_vm6, %v124_v50, 0.0 }
 0x281   :  { %v127_v53 = vsel %vm101_vm7, %v126_v51, %v125_v52 }
 0x282   :  { %128 = vst [vmem:[#allocation2] sm:$0xff] %v127_v53 }
 0x283   :  { %168 = shalt.err (!%p165_p4)
}
 0x284   :  { %138 = dma.vmem_to_hbm [thread:$0]  %s136_s13, 128, %s218_s2, [#allocation3]  }
 0x285   :  { %177 = dma.done.wait [#allocation3], 128  }
 0x286   :  { %178 = vsyncadd [#allocation3], 4294967168 }
 0x287   :  { %142 = vsyncpa [#allocation3], 1 }

</bundles_post_ra>
